<compile_context>
chip_gen: v7x
topology: tpu7x:2x2x1
jax: 0.10.0
libtpu: 0.0.40
codegen_flags: <defaults>
</compile_context>

<pallas_src>
import jax
import jax.numpy as jnp
from jax import lax
from jax.experimental import pallas as pl
from jax.experimental.pallas import tpu as pltpu


EPS = 1e-5
LANE = 128


def _round_up(n, m):
    return ((n + m - 1) // m) * m


def _bn_train_folded(h, gamma, beta):
    """BatchNorm1d (training mode) over axis 0, single reduction pass,
    gamma folded into the normalization scale on a (1, N) row."""
    inv_b = jnp.float32(1.0 / h.shape[0])
    mean = jnp.sum(h, axis=0, keepdims=True) * inv_b
    mean_sq = jnp.sum(h * h, axis=0, keepdims=True) * inv_b
    var = mean_sq - mean * mean                     # biased variance
    scale = gamma * lax.rsqrt(var + EPS)            # (1, N) fold
    shift = beta - mean * scale                     # (1, N) fold
    return h * scale + shift                        # 2 VALU ops / element


def actor_kernel(
    x_ref,
    w1_ref, b1_ref, g1_ref, be1_ref,
    w2_ref, b2_ref, g2_ref, be2_ref,
    w3_ref, g3_ref, be3_ref,
    o_ref,
):
    x = x_ref[...]

    # fc1 -> relu -> bn1
    h = jnp.dot(x, w1_ref[...], preferred_element_type=jnp.float32) + b1_ref[...]
    h = jnp.maximum(h, 0.0)
    h = _bn_train_folded(h, g1_ref[...], be1_ref[...])

    # fc2 -> relu -> bn2
    h = jnp.dot(h, w2_ref[...], preferred_element_type=jnp.float32) + b2_ref[...]
    h = jnp.maximum(h, 0.0)
    h = _bn_train_folded(h, g2_ref[...], be2_ref[...])

    # fc3 -> bn3 -> tanh   (fc3 bias omitted: cancelled by bn3 mean subtraction)
    h = jnp.dot(h, w3_ref[...], preferred_element_type=jnp.float32)
    h = _bn_train_folded(h, g3_ref[...], be3_ref[...])

    o_ref[...] = jnp.tanh(h)


def _pad_last(a, target):
    pad = target - a.shape[-1]
    if pad == 0:
        return a
    cfg = [(0, 0)] * (a.ndim - 1) + [(0, pad)]
    return jnp.pad(a, cfg)


def _pad_rows(a, target):
    pad = target - a.shape[0]
    if pad == 0:
        return a
    return jnp.pad(a, [(0, pad), (0, 0)])


def actor_forward_batched(states, params):
    """states: (T, B, state_size) -> (T, B, action_size).

    The T minibatches are independent (each gets its own training-mode BN
    statistics), equivalent to T separate forward() calls but amortized into
    a single pallas_call; weights stay resident in VMEM across grid steps.
    """
    T, B, S = states.shape
    F1 = params["w1"].shape[1]
    F2 = params["w2"].shape[1]
    A = params["w3"].shape[1]
    SP = _round_up(S, LANE)   # lane-dense input features
    AP = _round_up(A, LANE)   # lane-dense output features

    x_p = _pad_last(states.astype(jnp.float32), SP)
    w1_p = _pad_rows(params["w1"], SP)            # zero rows: padded features contribute 0
    w3_p = _pad_last(params["w3"], AP)            # zero cols: padded outputs are exactly 0
    g3_p = _pad_last(params["g3"], AP)
    be3_p = _pad_last(params["be3"], AP)

    inputs = (
        x_p,
        w1_p, params["b1"], params["g1"], params["be1"],
        params["w2"], params["b2"], params["g2"], params["be2"],
        w3_p, g3_p, be3_p,
    )

    def resident(shape):
        # Constant index_map -> block stays resident in VMEM across grid steps.
        return pl.BlockSpec(shape, lambda t, _s=shape: tuple(0 for _ in _s))

    in_specs = [
        pl.BlockSpec((None, B, SP), lambda t: (t, 0, 0)),
        resident((SP, F1)), resident((1, F1)), resident((1, F1)), resident((1, F1)),
        resident((F1, F2)), resident((1, F2)), resident((1, F2)), resident((1, F2)),
        resident((F2, AP)), resident((1, AP)), resident((1, AP)),
    ]
    out_spec = pl.BlockSpec((None, B, AP), lambda t: (t, 0, 0))

    out = pl.pallas_call(
        actor_kernel,
        out_shape=jax.ShapeDtypeStruct((T, B, AP), jnp.float32),
        grid=(T,),
        in_specs=in_specs,
        out_specs=out_spec,
        compiler_params=pltpu.CompilerParams(
            dimension_semantics=("parallel",)),
    )(*inputs)

    return out[:, :, :A]


def actor_forward(state, params):
    """state: (B, state_size) float32 -> (B, action_size)."""
    return actor_forward_batched(state[None], params)[0]


def init_actor_params(key, state_size, action_size, fc1_units=128, fc2_units=64):
    """Deterministic init mirroring the PyTorch module's reset_parameters.

    hidden_init uses layer.weight.size()[0] == out_features, so
    lim = 1/sqrt(out_features) for fc1/fc2; fc3 uses +/-0.003.
    Linear biases use PyTorch default uniform(+/-1/sqrt(in_features)).
    BatchNorm gamma=1, beta=0.
    """
    ks = jax.random.split(key, 6)

    lim1 = 1.0 / jnp.sqrt(jnp.float32(fc1_units))
    lim2 = 1.0 / jnp.sqrt(jnp.float32(fc2_units))

    w1 = jax.random.uniform(ks[0], (state_size, fc1_units), jnp.float32, -lim1, lim1)
    b1 = jax.random.uniform(ks[1], (1, fc1_units), jnp.float32,
                            -1.0 / jnp.sqrt(jnp.float32(state_size)),
                            1.0 / jnp.sqrt(jnp.float32(state_size)))

    w2 = jax.random.uniform(ks[2], (fc1_units, fc2_units), jnp.float32, -lim2, lim2)
    b2 = jax.random.uniform(ks[3], (1, fc2_units), jnp.float32,
                            -1.0 / jnp.sqrt(jnp.float32(fc1_units)),
                            1.0 / jnp.sqrt(jnp.float32(fc1_units)))

    w3 = jax.random.uniform(ks[4], (fc2_units, action_size), jnp.float32, -0.003, 0.003)
    b3 = jax.random.uniform(ks[5], (1, action_size), jnp.float32,
                            -1.0 / jnp.sqrt(jnp.float32(fc2_units)),
                            1.0 / jnp.sqrt(jnp.float32(fc2_units)))

    return {
        "w1": w1, "b1": b1, "g1": jnp.ones((1, fc1_units), jnp.float32),
        "be1": jnp.zeros((1, fc1_units), jnp.float32),
        "w2": w2, "b2": b2, "g2": jnp.ones((1, fc2_units), jnp.float32),
        "be2": jnp.zeros((1, fc2_units), jnp.float32),
        "w3": w3, "b3": b3, "g3": jnp.ones((1, action_size), jnp.float32),
        "be3": jnp.zeros((1, action_size), jnp.float32),
    }


def _reference_forward(state, params):
    """Pure-JAX reference matching the PyTorch module (keeps b3, two-pass var)."""
    def bn(h, g, b):
        m = jnp.mean(h, axis=0, keepdims=True)
        v = jnp.mean((h - m) ** 2, axis=0, keepdims=True)
        return (h - m) / jnp.sqrt(v + EPS) * g + b

    h = jnp.maximum(state @ params["w1"] + params["b1"], 0.0)
    h = bn(h, params["g1"], params["be1"])
    h = jnp.maximum(h @ params["w2"] + params["b2"], 0.0)
    h = bn(h, params["g2"], params["be2"])
    h = h @ params["w3"] + params["b3"]
    h = bn(h, params["g3"], params["be3"])
    return jnp.tanh(h)


if __name__ == "__main__":
    key = jax.random.PRNGKey(0)
    k_param, k_state = jax.random.split(key)

    batch = 8
    state_size = 24      # e.g. Tennis env per-agent observation size
    action_size = 4
    T = 4                # independent minibatches fused into one launch

    params = init_actor_params(k_param, state_size, action_size)

    # Single minibatch.
    state = jax.random.normal(k_state, (batch, state_size), jnp.float32)
    out = jax.block_until_ready(actor_forward(state, params))
    ref = _reference_forward(state, params)
    assert out.shape == (batch, action_size)
    assert jnp.allclose(out, ref, atol=1e-5, rtol=1e-5)

    # T independent minibatches in one pallas_call (weights resident across
    # grid steps, per-minibatch BN stats == T separate forward() calls).
    states = jax.random.normal(k_state, (T, batch, state_size), jnp.float32)
    outs = jax.block_until_ready(actor_forward_batched(states, params))
    refs = jnp.stack([_reference_forward(states[t], params) for t in range(T)])
    assert outs.shape == (T, batch, action_size)
    assert jnp.allclose(outs, refs, atol=1e-5, rtol=1e-5)

    print("KERNEL_OK")
</pallas_src>

<mosaic_0001>
module attributes {stable_mosaic.version = 11 : i64} {
  func.func @actor_kernel(%arg0: i32, %arg1: memref<1x8x128xf32, #tpu.memory_space<vmem>>, %arg2: memref<128x128xf32, #tpu.memory_space<vmem>>, %arg3: memref<1x128xf32, #tpu.memory_space<vmem>>, %arg4: memref<1x128xf32, #tpu.memory_space<vmem>>, %arg5: memref<1x128xf32, #tpu.memory_space<vmem>>, %arg6: memref<128x64xf32, #tpu.memory_space<vmem>>, %arg7: memref<1x64xf32, #tpu.memory_space<vmem>>, %arg8: memref<1x64xf32, #tpu.memory_space<vmem>>, %arg9: memref<1x64xf32, #tpu.memory_space<vmem>>, %arg10: memref<64x128xf32, #tpu.memory_space<vmem>>, %arg11: memref<1x128xf32, #tpu.memory_space<vmem>>, %arg12: memref<1x128xf32, #tpu.memory_space<vmem>>, %arg13: memref<1x8x128xf32, #tpu.memory_space<vmem>>) attributes {dimension_semantics = [#tpu.dimension_semantics<parallel>], iteration_bounds = array<i64: 1>, scalar_prefetch = 0 : i64, scratch_operands = 0 : i64, tpu.core_type = #tpu.core_type<tc>, window_params = [{transform_indices = @transform_0, window_bounds = array<i64: 1, 8, 128>}, {pipeline_mode = #tpu.pipeline_mode<synchronous>, transform_indices = @transform_1, window_bounds = array<i64: 128, 128>}, {pipeline_mode = #tpu.pipeline_mode<synchronous>, transform_indices = @transform_2, window_bounds = array<i64: 1, 128>}, {pipeline_mode = #tpu.pipeline_mode<synchronous>, transform_indices = @transform_3, window_bounds = array<i64: 1, 128>}, {pipeline_mode = #tpu.pipeline_mode<synchronous>, transform_indices = @transform_4, window_bounds = array<i64: 1, 128>}, {pipeline_mode = #tpu.pipeline_mode<synchronous>, transform_indices = @transform_5, window_bounds = array<i64: 128, 64>}, {pipeline_mode = #tpu.pipeline_mode<synchronous>, transform_indices = @transform_6, window_bounds = array<i64: 1, 64>}, {pipeline_mode = #tpu.pipeline_mode<synchronous>, transform_indices = @transform_7, window_bounds = array<i64: 1, 64>}, {pipeline_mode = #tpu.pipeline_mode<synchronous>, transform_indices = @transform_8, window_bounds = array<i64: 1, 64>}, {pipeline_mode = #tpu.pipeline_mode<synchronous>, transform_indices = @transform_9, window_bounds = array<i64: 64, 128>}, {pipeline_mode = #tpu.pipeline_mode<synchronous>, transform_indices = @transform_10, window_bounds = array<i64: 1, 128>}, {pipeline_mode = #tpu.pipeline_mode<synchronous>, transform_indices = @transform_11, window_bounds = array<i64: 1, 128>}, {transform_indices = @transform_12, window_bounds = array<i64: 1, 8, 128>}]} {
    %c0 = arith.constant 0 : index
    %c0_0 = arith.constant 0 : index
    %c0_1 = arith.constant 0 : index
    %0 = vector.load %arg1[%c0, %c0_0, %c0_1] : memref<1x8x128xf32, #tpu.memory_space<vmem>>, vector<1x8x128xf32>
    %1 = vector.shape_cast %0 : vector<1x8x128xf32> to vector<8x128xf32>
    %c0_2 = arith.constant 0 : index
    %c0_3 = arith.constant 0 : index
    %2 = vector.load %arg2[%c0_2, %c0_3] : memref<128x128xf32, #tpu.memory_space<vmem>>, vector<128x128xf32>
    %cst = arith.constant dense<0.000000e+00> : vector<8x128xf32>
    %3 = tpu.matmul %1, %2, %cst {dimension_numbers = #tpu.dot_dimension_numbers<[1], [0], [0], [1], [0, 0, 1, 1], [], []>} : vector<8x128xf32>, vector<128x128xf32>, vector<8x128xf32> -> vector<8x128xf32>
    %c0_4 = arith.constant 0 : index
    %c0_5 = arith.constant 0 : index
    %4 = vector.load %arg3[%c0_4, %c0_5] : memref<1x128xf32, #tpu.memory_space<vmem>>, vector<1x128xf32>
    %5 = vector.broadcast %4 : vector<1x128xf32> to vector<8x128xf32>
    %6 = arith.addf %3, %5 : vector<8x128xf32>
    %cst_6 = arith.constant 0.000000e+00 : f32
    %7 = vector.broadcast %cst_6 : f32 to vector<8x128xf32>
    %8 = arith.maximumf %6, %7 : vector<8x128xf32>
    %c0_7 = arith.constant 0 : index
    %c0_8 = arith.constant 0 : index
    %9 = vector.load %arg4[%c0_7, %c0_8] : memref<1x128xf32, #tpu.memory_space<vmem>>, vector<1x128xf32>
    %c0_9 = arith.constant 0 : index
    %c0_10 = arith.constant 0 : index
    %10 = vector.load %arg5[%c0_9, %c0_10] : memref<1x128xf32, #tpu.memory_space<vmem>>, vector<1x128xf32>
    %cst_11 = arith.constant dense<0.000000e+00> : vector<128xf32>
    %11 = vector.multi_reduction <add>, %8, %cst_11 [0] : vector<8x128xf32> to vector<128xf32>
    %12 = vector.shape_cast %11 : vector<128xf32> to vector<1x128xf32>
    %cst_12 = arith.constant 1.250000e-01 : f32
    %13 = vector.broadcast %cst_12 : f32 to vector<1x128xf32>
    %14 = arith.mulf %12, %13 : vector<1x128xf32>
    %15 = arith.mulf %8, %8 : vector<8x128xf32>
    %cst_13 = arith.constant dense<0.000000e+00> : vector<128xf32>
    %16 = vector.multi_reduction <add>, %15, %cst_13 [0] : vector<8x128xf32> to vector<128xf32>
    %17 = vector.shape_cast %16 : vector<128xf32> to vector<1x128xf32>
    %cst_14 = arith.constant 1.250000e-01 : f32
    %18 = vector.broadcast %cst_14 : f32 to vector<1x128xf32>
    %19 = arith.mulf %17, %18 : vector<1x128xf32>
    %20 = arith.mulf %14, %14 : vector<1x128xf32>
    %21 = arith.subf %19, %20 : vector<1x128xf32>
    %cst_15 = arith.constant 9.99999974E-6 : f32
    %22 = vector.broadcast %cst_15 : f32 to vector<1x128xf32>
    %23 = arith.addf %21, %22 : vector<1x128xf32>
    %24 = math.rsqrt %23 : vector<1x128xf32>
    %25 = arith.mulf %9, %24 : vector<1x128xf32>
    %26 = arith.mulf %14, %25 : vector<1x128xf32>
    %27 = arith.subf %10, %26 : vector<1x128xf32>
    %28 = vector.broadcast %25 : vector<1x128xf32> to vector<8x128xf32>
    %29 = arith.mulf %8, %28 : vector<8x128xf32>
    %30 = vector.broadcast %27 : vector<1x128xf32> to vector<8x128xf32>
    %31 = arith.addf %29, %30 : vector<8x128xf32>
    %c0_16 = arith.constant 0 : index
    %c0_17 = arith.constant 0 : index
    %32 = vector.load %arg6[%c0_16, %c0_17] : memref<128x64xf32, #tpu.memory_space<vmem>>, vector<128x64xf32>
    %cst_18 = arith.constant dense<0.000000e+00> : vector<8x64xf32>
    %33 = tpu.matmul %31, %32, %cst_18 {dimension_numbers = #tpu.dot_dimension_numbers<[1], [0], [0], [1], [0, 0, 1, 1], [], []>} : vector<8x128xf32>, vector<128x64xf32>, vector<8x64xf32> -> vector<8x64xf32>
    %c0_19 = arith.constant 0 : index
    %c0_20 = arith.constant 0 : index
    %34 = vector.load %arg7[%c0_19, %c0_20] : memref<1x64xf32, #tpu.memory_space<vmem>>, vector<1x64xf32>
    %35 = vector.broadcast %34 : vector<1x64xf32> to vector<8x64xf32>
    %36 = arith.addf %33, %35 : vector<8x64xf32>
    %cst_21 = arith.constant 0.000000e+00 : f32
    %37 = vector.broadcast %cst_21 : f32 to vector<8x64xf32>
    %38 = arith.maximumf %36, %37 : vector<8x64xf32>
    %c0_22 = arith.constant 0 : index
    %c0_23 = arith.constant 0 : index
    %39 = vector.load %arg8[%c0_22, %c0_23] : memref<1x64xf32, #tpu.memory_space<vmem>>, vector<1x64xf32>
    %c0_24 = arith.constant 0 : index
    %c0_25 = arith.constant 0 : index
    %40 = vector.load %arg9[%c0_24, %c0_25] : memref<1x64xf32, #tpu.memory_space<vmem>>, vector<1x64xf32>
    %cst_26 = arith.constant dense<0.000000e+00> : vector<64xf32>
    %41 = vector.multi_reduction <add>, %38, %cst_26 [0] : vector<8x64xf32> to vector<64xf32>
    %42 = vector.shape_cast %41 : vector<64xf32> to vector<1x64xf32>
    %cst_27 = arith.constant 1.250000e-01 : f32
    %43 = vector.broadcast %cst_27 : f32 to vector<1x64xf32>
    %44 = arith.mulf %42, %43 : vector<1x64xf32>
    %45 = arith.mulf %38, %38 : vector<8x64xf32>
    %cst_28 = arith.constant dense<0.000000e+00> : vector<64xf32>
    %46 = vector.multi_reduction <add>, %45, %cst_28 [0] : vector<8x64xf32> to vector<64xf32>
    %47 = vector.shape_cast %46 : vector<64xf32> to vector<1x64xf32>
    %cst_29 = arith.constant 1.250000e-01 : f32
    %48 = vector.broadcast %cst_29 : f32 to vector<1x64xf32>
    %49 = arith.mulf %47, %48 : vector<1x64xf32>
    %50 = arith.mulf %44, %44 : vector<1x64xf32>
    %51 = arith.subf %49, %50 : vector<1x64xf32>
    %cst_30 = arith.constant 9.99999974E-6 : f32
    %52 = vector.broadcast %cst_30 : f32 to vector<1x64xf32>
    %53 = arith.addf %51, %52 : vector<1x64xf32>
    %54 = math.rsqrt %53 : vector<1x64xf32>
    %55 = arith.mulf %39, %54 : vector<1x64xf32>
    %56 = arith.mulf %44, %55 : vector<1x64xf32>
    %57 = arith.subf %40, %56 : vector<1x64xf32>
    %58 = vector.broadcast %55 : vector<1x64xf32> to vector<8x64xf32>
    %59 = arith.mulf %38, %58 : vector<8x64xf32>
    %60 = vector.broadcast %57 : vector<1x64xf32> to vector<8x64xf32>
    %61 = arith.addf %59, %60 : vector<8x64xf32>
    %c0_31 = arith.constant 0 : index
    %c0_32 = arith.constant 0 : index
    %62 = vector.load %arg10[%c0_31, %c0_32] : memref<64x128xf32, #tpu.memory_space<vmem>>, vector<64x128xf32>
    %cst_33 = arith.constant dense<0.000000e+00> : vector<8x128xf32>
    %63 = tpu.matmul %61, %62, %cst_33 {dimension_numbers = #tpu.dot_dimension_numbers<[1], [0], [0], [1], [0, 0, 1, 1], [], []>} : vector<8x64xf32>, vector<64x128xf32>, vector<8x128xf32> -> vector<8x128xf32>
    %c0_34 = arith.constant 0 : index
    %c0_35 = arith.constant 0 : index
    %64 = vector.load %arg11[%c0_34, %c0_35] : memref<1x128xf32, #tpu.memory_space<vmem>>, vector<1x128xf32>
    %c0_36 = arith.constant 0 : index
    %c0_37 = arith.constant 0 : index
    %65 = vector.load %arg12[%c0_36, %c0_37] : memref<1x128xf32, #tpu.memory_space<vmem>>, vector<1x128xf32>
    %cst_38 = arith.constant dense<0.000000e+00> : vector<128xf32>
    %66 = vector.multi_reduction <add>, %63, %cst_38 [0] : vector<8x128xf32> to vector<128xf32>
    %67 = vector.shape_cast %66 : vector<128xf32> to vector<1x128xf32>
    %cst_39 = arith.constant 1.250000e-01 : f32
    %68 = vector.broadcast %cst_39 : f32 to vector<1x128xf32>
    %69 = arith.mulf %67, %68 : vector<1x128xf32>
    %70 = arith.mulf %63, %63 : vector<8x128xf32>
    %cst_40 = arith.constant dense<0.000000e+00> : vector<128xf32>
    %71 = vector.multi_reduction <add>, %70, %cst_40 [0] : vector<8x128xf32> to vector<128xf32>
    %72 = vector.shape_cast %71 : vector<128xf32> to vector<1x128xf32>
    %cst_41 = arith.constant 1.250000e-01 : f32
    %73 = vector.broadcast %cst_41 : f32 to vector<1x128xf32>
    %74 = arith.mulf %72, %73 : vector<1x128xf32>
    %75 = arith.mulf %69, %69 : vector<1x128xf32>
    %76 = arith.subf %74, %75 : vector<1x128xf32>
    %cst_42 = arith.constant 9.99999974E-6 : f32
    %77 = vector.broadcast %cst_42 : f32 to vector<1x128xf32>
    %78 = arith.addf %76, %77 : vector<1x128xf32>
    %79 = math.rsqrt %78 : vector<1x128xf32>
    %80 = arith.mulf %64, %79 : vector<1x128xf32>
    %81 = arith.mulf %69, %80 : vector<1x128xf32>
    %82 = arith.subf %65, %81 : vector<1x128xf32>
    %83 = vector.broadcast %80 : vector<1x128xf32> to vector<8x128xf32>
    %84 = arith.mulf %63, %83 : vector<8x128xf32>
    %85 = vector.broadcast %82 : vector<1x128xf32> to vector<8x128xf32>
    %86 = arith.addf %84, %85 : vector<8x128xf32>
    %87 = math.tanh %86 : vector<8x128xf32>
    %c0_43 = arith.constant 0 : index
    %c0_44 = arith.constant 0 : index
    %c0_45 = arith.constant 0 : index
    %88 = vector.load %arg13[%c0_43, %c0_44, %c0_45] : memref<1x8x128xf32, #tpu.memory_space<vmem>>, vector<1x8x128xf32>
    %89 = vector.shape_cast %88 : vector<1x8x128xf32> to vector<8x128xf32>
    %90 = vector.shape_cast %87 : vector<8x128xf32> to vector<1x8x128xf32>
    tpu.vector_store %arg13[%c0_43, %c0_44, %c0_45], %90 {strides = array<i32>} : memref<1x8x128xf32, #tpu.memory_space<vmem>>, vector<1x8x128xf32>,
    return
  }
  func.func @transform_0(%arg0: i32) -> (i32, i32, i32) {
    %c0_i32 = arith.constant 0 : i32
    %c0_i32_0 = arith.constant 0 : i32
    %c0_i32_1 = arith.constant 0 : i32
    return %arg0, %c0_i32, %c0_i32_0 : i32, i32, i32
  }
  func.func @transform_1(%arg0: i32) -> (i32, i32) {
    %c0_i32 = arith.constant 0 : i32
    %c0_i32_0 = arith.constant 0 : i32
    %c0_i32_1 = arith.constant 0 : i32
    return %c0_i32, %c0_i32_0 : i32, i32
  }
  func.func @transform_2(%arg0: i32) -> (i32, i32) {
    %c0_i32 = arith.constant 0 : i32
    %c0_i32_0 = arith.constant 0 : i32
    %c0_i32_1 = arith.constant 0 : i32
    return %c0_i32, %c0_i32_0 : i32, i32
  }
  func.func @transform_3(%arg0: i32) -> (i32, i32) {
    %c0_i32 = arith.constant 0 : i32
    %c0_i32_0 = arith.constant 0 : i32
    %c0_i32_1 = arith.constant 0 : i32
    return %c0_i32, %c0_i32_0 : i32, i32
  }
  func.func @transform_4(%arg0: i32) -> (i32, i32) {
    %c0_i32 = arith.constant 0 : i32
    %c0_i32_0 = arith.constant 0 : i32
    %c0_i32_1 = arith.constant 0 : i32
    return %c0_i32, %c0_i32_0 : i32, i32
  }
  func.func @transform_5(%arg0: i32) -> (i32, i32) {
    %c0_i32 = arith.constant 0 : i32
    %c0_i32_0 = arith.constant 0 : i32
    %c0_i32_1 = arith.constant 0 : i32
    return %c0_i32, %c0_i32_0 : i32, i32
  }
  func.func @transform_6(%arg0: i32) -> (i32, i32) {
    %c0_i32 = arith.constant 0 : i32
    %c0_i32_0 = arith.constant 0 : i32
    %c0_i32_1 = arith.constant 0 : i32
    return %c0_i32, %c0_i32_0 : i32, i32
  }
  func.func @transform_7(%arg0: i32) -> (i32, i32) {
    %c0_i32 = arith.constant 0 : i32
    %c0_i32_0 = arith.constant 0 : i32
    %c0_i32_1 = arith.constant 0 : i32
    return %c0_i32, %c0_i32_0 : i32, i32
  }
  func.func @transform_8(%arg0: i32) -> (i32, i32) {
    %c0_i32 = arith.constant 0 : i32
    %c0_i32_0 = arith.constant 0 : i32
    %c0_i32_1 = arith.constant 0 : i32
    return %c0_i32, %c0_i32_0 : i32, i32
  }
  func.func @transform_9(%arg0: i32) -> (i32, i32) {
    %c0_i32 = arith.constant 0 : i32
    %c0_i32_0 = arith.constant 0 : i32
    %c0_i32_1 = arith.constant 0 : i32
    return %c0_i32, %c0_i32_0 : i32, i32
  }
  func.func @transform_10(%arg0: i32) -> (i32, i32) {
    %c0_i32 = arith.constant 0 : i32
    %c0_i32_0 = arith.constant 0 : i32
    %c0_i32_1 = arith.constant 0 : i32
    return %c0_i32, %c0_i32_0 : i32, i32
  }
  func.func @transform_11(%arg0: i32) -> (i32, i32) {
    %c0_i32 = arith.constant 0 : i32
    %c0_i32_0 = arith.constant 0 : i32
    %c0_i32_1 = arith.constant 0 : i32
    return %c0_i32, %c0_i32_0 : i32, i32
  }
  func.func @transform_12(%arg0: i32) -> (i32, i32, i32) {
    %c0_i32 = arith.constant 0 : i32
    %c0_i32_0 = arith.constant 0 : i32
    %c0_i32_1 = arith.constant 0 : i32
    return %arg0, %c0_i32, %c0_i32_0 : i32, i32, i32
  }
}

</mosaic_0001>

<bundles_post_ra>
// kernel: tpu_custom_call.1
= control target key start
LH: loop header
LB: loop body
LE: loop exit
PB: predicated region body
PF: predicated region fallthrough
CT: control target
= control target key end

     0   :  { %17 = vsyncpa [#allocation3], 0  ;;  %s986_s0 = inlined_call_operand.hbm [shape: f32[1,8,128], index: 0, kind: input, shape index: {}]   ;;  %s987_s1 = inlined_call_operand.vmem [shape: f32[128,128], index: 1, kind: input, shape index: {}]   ;;  %s988_s2 = inlined_call_operand.vmem [shape: f32[1,128], index: 2, kind: input, shape index: {}]   ;;  %s989_s3 = inlined_call_operand.vmem [shape: f32[1,128], index: 3, kind: input, shape index: {}]   ;;  %s990_s4 = inlined_call_operand.vmem [shape: f32[1,128], index: 4, kind: input, shape index: {}]   ;;  %s991_s5 = inlined_call_operand.vmem [shape: f32[128,64], index: 5, kind: input, shape index: {}]   ;;  %s992_s6 = inlined_call_operand.vmem [shape: f32[1,64], index: 6, kind: input, shape index: {}]   ;;  %s993_s7 = inlined_call_operand.vmem [shape: f32[1,64], index: 7, kind: input, shape index: {}]   ;;  %s994_s8 = inlined_call_operand.vmem [shape: f32[1,64], index: 8, kind: input, shape index: {}]   ;;  %s995_s9 = inlined_call_operand.vmem [shape: f32[64,128], index: 9, kind: input, shape index: {}]   ;;  %s996_s10 = inlined_call_operand.vmem [shape: f32[1,128], index: 10, kind: input, shape index: {}]   ;;  %s997_s11 = inlined_call_operand.vmem [shape: f32[1,128], index: 11, kind: input, shape index: {}]   ;;  %s998_s12 = inlined_call_operand.hbm [shape: f32[1,8,128], index: 12, kind: output, shape index: {}]  }
   0x1   :  { %18 = vsyncpa [#allocation4], 0  ;;  %s714_s21 = smov [#allocation2]   ;;  %s666_s25 = scalar_lea.hbm %s986_s0, 128 }
   0x2   :  { %s25_s22 = sshll.u32 %s714_s21, 4  ;;  %p667_p0 = scmp.ne.s32.totalorder %s986_s0, %s666_s25  ;;  %s26_s22 = int_to_ptr.vmem [resolvable:$true] %s25_s22 }
   0x3   :  { %p670_p1 = scmp.lt.u32.totalorder %s666_s25, %s986_s0 }
   0x5   :  { %p672_p2 = pnand %p670_p1, %p667_p0 }
   0x7   :  { %675 = shalt.err (!%p672_p2)
}
   0x8   :  { %s676_s30 = scalar_lea.vmem %s26_s22, 128  ;;  %p681_p4 = scmp.lt.s32.totalorder %s26_s22, %s26_s22 }
   0x9   :  { %p677_p3 = scmp.ne.s32.totalorder %s26_s22, %s676_s30  ;;  %p682_p5 = scmp.lt.s32.totalorder %s676_s30, %s676_s30 }
   0xb   :  { %p683_p6 = por %p682_p5, %p681_p4 }
   0xd   :  { %p684_p7 = pnand %p683_p6, %p677_p3 }
   0xf   :  { %687 = shalt.err (!%p684_p7)
}
  0x10   :  { %28 = dma.hbm_to_vmem [thread:$0]  %s986_s0, 128, %s26_s22, [#allocation3]  }
  0x11   :  { %710 = dma.done.wait [#allocation3], 128  }
  0x12   :  { %711 = vsyncadd [#allocation3], 4294967168  ;;  %v715_v0 = vmov 0.0|0.0   ;;  %vm716_vm0 = vmmov 0   ;;  %v717_v1 = vmov 0.0   ;;  %v55_v2 = vld [vmem:[%s987_s1] sm:$0xff] }
  0x13   :  { %593 = vmatprep.subr.bf16.mxu0 %v715_v0  ;;  %536 = vmatprep.mubr.msk.f32.mxu0 %vm716_vm0, %v717_v1  ;;  %v56_v3 = vld [vmem:[%s987_s1 + $0x8] sm:$0xff]  ;;  %v57_v4 = vld [vmem:[%s987_s1 + $0x10] sm:$0xff]  ;;  %v58_v6 = vld [vmem:[%s987_s1 + $0x18] sm:$0xff]  ;;  %vm283_vm1 = vcmask 523264   ;;  %s718_s21 = smov [#allocation5]  }
  0x14   :  { %617 = vmatprep.subr.bf16.mxu1 %v715_v0  ;;  %571 = vmatprep.mubr.msk.f32.mxu1 %vm716_vm0, %v717_v1  ;;  %v594_v5 = vpack.c.bf16 %v56_v3, %v55_v2  ;;  %v597_v7 = vpack.c.bf16 %v58_v6, %v57_v4  ;;  %v59_v8 = vld [vmem:[%s987_s1 + $0x20] sm:$0xff]  ;;  %v60_v9 = vld [vmem:[%s987_s1 + $0x28] sm:$0xff]  ;;  %v61_v11 = vld [vmem:[%s987_s1 + $0x30] sm:$0xff]  ;;  %s449_s22 = sshll.u32 %s718_s21, 4  ;;  %s450_s22 = int_to_ptr.vmem [resolvable:$true] %s449_s22 }
  0x15   :  { %v600_v10 = vpack.c.bf16 %v60_v9, %v59_v8  ;;  %v62_v12 = vld [vmem:[%s987_s1 + $0x38] sm:$0xff]  ;;  %v63_v14 = vld [vmem:[%s987_s1 + $0x40] sm:$0xff]  ;;  %v64_v15 = vld [vmem:[%s987_s1 + $0x48] sm:$0xff]  ;;  %p693_p9 = scmp.lt.s32.totalorder %s450_s22, %s450_s22 }
  0x16   :  { %595 = vmatpush3.bf16.msra.mxu0 %v594_v5  ;;  %v603_v13 = vpack.c.bf16 %v62_v12, %v61_v11  ;;  %v606_v16 = vpack.c.bf16 %v64_v15, %v63_v14  ;;  %v65_v17 = vld [vmem:[%s987_s1 + $0x50] sm:$0xff]  ;;  %v66_v18 = vld [vmem:[%s987_s1 + $0x58] sm:$0xff]  ;;  %v67_v20 = vld [vmem:[%s987_s1 + $0x60] sm:$0xff]  ;;  %v174_v11 = vlaneseq }
  0x17   :  { %596 = vmatprep.subr.bf16.mxu0 %v715_v0  ;;  %v609_v19 = vpack.c.bf16 %v66_v18, %v65_v17  ;;  %v68_v21 = vld [vmem:[%s987_s1 + $0x68] sm:$0xff]  ;;  %v69_v23 = vld [vmem:[%s987_s1 + $0x70] sm:$0xff]  ;;  %v70_v24 = vld [vmem:[%s987_s1 + $0x78] sm:$0xff] }
  0x18   :  { %v612_v22 = vpack.c.bf16 %v68_v21, %v67_v20  ;;  %v615_v25 = vpack.c.bf16 %v70_v24, %v69_v23  ;;  %v54_v26 = vld [vmem:[#allocation2] sm:$0xff]  ;;  %v188_v28 = vld [vmem:[%s991_s5 + $0x8] sm:$0xff]  ;;  %v189_v30 = vld [vmem:[%s991_s5 + $0x10] sm:$0xff]  ;;  %v175_v12 = vshrl.u32 %v174_v11, 7 }
  0x19   :  { %v187_v27 = vld [vmem:[%s991_s5] sm:$0xff]  ;;  %v190_v31 = vld [vmem:[%s991_s5 + $0x18] sm:$0xff]  ;;  %v192_v34 = vld [vmem:[%s991_s5 + $0x28] sm:$0xff] }
  0x1a   :  { %598 = vmatpush3.bf16.msra.mxu0 %v597_v7  ;;  %v618_v29 = vpack.c.bf16 %v188_v28, %v187_v27  ;;  %v621_v32 = vpack.c.bf16 %v190_v31, %v189_v30  ;;  %v191_v33 = vld [vmem:[%s991_s5 + $0x20] sm:$0xff]  ;;  %v193_v36 = vld [vmem:[%s991_s5 + $0x30] sm:$0xff]  ;;  %v194_v37 = vld [vmem:[%s991_s5 + $0x38] sm:$0xff]  ;;  %v918_v14 = vsub.s32 0, %v175_v12 }
  0x1b   :  { %599 = vmatprep.subr.bf16.mxu0 %v715_v0  ;;  %v624_v35 = vpack.c.bf16 %v192_v34, %v191_v33  ;;  %v627_v38 = vpack.c.bf16 %v194_v37, %v193_v36  ;;  %v195_v39 = vld [vmem:[%s991_s5 + $0x40] sm:$0xff]  ;;  %v196_v40 = vld [vmem:[%s991_s5 + $0x48] sm:$0xff]  ;;  %v197_v42 = vld [vmem:[%s991_s5 + $0x50] sm:$0xff] }
  0x1c   :  { %619 = vmatpush3.bf16.msra.mxu1 %v618_v29  ;;  %v630_v41 = vpack.c.bf16 %v196_v40, %v195_v39  ;;  %v198_v43 = vld [vmem:[%s991_s5 + $0x58] sm:$0xff]  ;;  %v199_v45 = vld [vmem:[%s991_s5 + $0x60] sm:$0xff]  ;;  %v200_v46 = vld [vmem:[%s991_s5 + $0x68] sm:$0xff] }
  0x1d   :  { %620 = vmatprep.subr.bf16.mxu1 %v715_v0  ;;  %v633_v44 = vpack.c.bf16 %v198_v43, %v197_v42  ;;  %v636_v47 = vpack.c.bf16 %v200_v46, %v199_v45  ;;  %v201_v48 = vld [vmem:[%s991_s5 + $0x70] sm:$0xff]  ;;  %v202_v49 = vld [vmem:[%s991_s5 + $0x78] sm:$0xff]  ;;  %v458_v51 = vld [vmem:[%s988_s2] ss:$0 sm:$0xff] }
  0x1e   :  { %601 = vmatpush3.bf16.msra.mxu0 %v600_v10  ;;  %v639_v50 = vpack.c.bf16 %v202_v49, %v201_v48  ;;  %v150_v17 = vld [vmem:[%s990_s4] sm:$0x1]  ;;  %v324_v27 = vld [vmem:[%s995_s9 + $0x10] sm:$0xff]  ;;  %v325_v28 = vld [vmem:[%s995_s9 + $0x18] sm:$0xff] }
  0x1f   :  { %602 = vmatprep.subr.bf16.mxu0 %v715_v0  ;;  %v322_v24 = vld [vmem:[%s995_s9] sm:$0xff]  ;;  %v645_v29 = vpack.c.bf16 %v325_v28, %v324_v27  ;;  %v327_v31 = vld [vmem:[%s995_s9 + $0x28] sm:$0xff]  ;;  %v328_v33 = vld [vmem:[%s995_s9 + $0x30] sm:$0xff] }
  0x20   :  { %622 = vmatpush3.bf16.msra.mxu1 %v621_v32  ;;  %v326_v30 = vld [vmem:[%s995_s9 + $0x20] sm:$0xff]  ;;  %v329_v34 = vld [vmem:[%s995_s9 + $0x38] sm:$0xff] }
  0x21   :  { %623 = vmatprep.subr.bf16.mxu1 %v715_v0  ;;  %v648_v32 = vpack.c.bf16 %v327_v31, %v326_v30  ;;  %v459_v36 = vld [vmem:[%s992_s6] ss:$0 sm:$0xff] }
  0x22   :  { %604 = vmatpush3.bf16.msra.mxu0 %v603_v13  ;;  %v149_v13 = vld [vmem:[%s989_s3] sm:$0x1] }
  0x23   :  { %605 = vmatprep.subr.bf16.mxu0 %v715_v0  ;;  %v403_v28 = vld [vmem:[%s996_s10] sm:$0x1]  ;;  %s688_s10 = scalar_lea.vmem %s450_s22, 128 }
  0x24   :  { %625 = vmatpush3.bf16.msra.mxu1 %v624_v35  ;;  %v651_v35 = vpack.c.bf16 %v329_v34, %v328_v33  ;;  %v404_v31 = vld [vmem:[%s997_s11] sm:$0x1]  ;;  %p689_p8 = scmp.ne.s32.totalorder %s450_s22, %s688_s10  ;;  %p694_p10 = scmp.lt.s32.totalorder %s688_s10, %s688_s10 }
  0x25   :  { %626 = vmatprep.subr.bf16.mxu1 %v715_v0 }
  0x26   :  { %607 = vmatpush3.bf16.msra.mxu0 %v606_v16  ;;  %p695_p11 = por %p694_p10, %p693_p9 }
  0x27   :  { %608 = vmatprep.subr.bf16.mxu0 %v715_v0 }
  0x28   :  { %628 = vmatpush3.bf16.msra.mxu1 %v627_v38  ;;  %p696_p12 = pnand %p695_p11, %p689_p8 }
  0x29   :  { %629 = vmatprep.subr.bf16.mxu1 %v715_v0 }
  0x2a   :  { %610 = vmatpush3.bf16.msra.mxu0 %v609_v19 }
  0x2b   :  { %611 = vmatprep.subr.bf16.mxu0 %v715_v0 }
  0x2c   :  { %631 = vmatpush3.bf16.msra.mxu1 %v630_v41 }
  0x2d   :  { %632 = vmatprep.subr.bf16.mxu1 %v715_v0 }
  0x2e   :  { %613 = vmatpush3.bf16.msra.mxu0 %v612_v22 }
  0x2f   :  { %614 = vmatprep.subr.bf16.mxu0 %v715_v0 }
  0x30   :  { %634 = vmatpush3.bf16.msra.mxu1 %v633_v44 }
  0x31   :  { %635 = vmatprep.subr.bf16.mxu1 %v715_v0 }
  0x32   :  { %616 = vmatpush3.bf16.msra.mxu0 %v615_v25  ;;  %v323_v25 = vld [vmem:[%s995_s9 + $0x8] sm:$0xff] }
  0x33   :  { %641 = vmatprep.subr.bf16.mxu0 %v715_v0 }
  0x34   :  { %637 = vmatpush3.bf16.msra.mxu1 %v636_v47 }
  0x35   :  { %537 = vmatmul.mubr.f32.vlgmr.msra.gmra.mrb[0].mxu0 %v54_v26  ;;  %638 = vmatprep.subr.bf16.mxu1 %v715_v0  ;;  %v642_v26 = vpack.c.bf16 %v323_v25, %v322_v24 }
  0x36   :  { %590 = vmatprep.mubr.msk.f32.mxu0 %vm716_vm0, %v717_v1 }
  0x37   :  { %643 = vmatpush3.bf16.msra.mxu0 %v642_v26 }
  0x38   :  { %640 = vmatpush3.bf16.msra.mxu1 %v639_v50  ;;  %644 = vmatprep.subr.bf16.mxu0 %v715_v0 }
  0x3b   :  { %646 = vmatpush3.bf16.msra.mxu0 %v645_v29 }
  0x3c   :  { %647 = vmatprep.subr.bf16.mxu0 %v715_v0 }
  0x3f   :  { %649 = vmatpush3.bf16.msra.mxu0 %v648_v32 }
  0x40   :  { %650 = vmatprep.subr.bf16.mxu0 %v715_v0 }
  0x43   :  { %652 = vmatpush3.bf16.msra.mxu0 %v651_v35 }
 0x108   :  { %v144_v52 = vpop.f32.mrb[0].mxu0 }
 0x109   :  { %v145_v53 = vadd.f32 %v458_v51, %v144_v52  ;;  %v538_v54 = vpop.f32.mrb[1].mxu0 }
 0x10b   :  { %v148_v55 = vmax.f32 %v145_v53, 0.0 }
 0x10d   :  { %v151_v56 = vrot.slane %v148_v55, 4  ;;  %v158_v57 = vmul.f32 %v148_v55, %v148_v55 }
 0x10f   :  { %v152_v58 = vadd.f32 %v151_v56, %v148_v55  ;;  %v159_v59 = vrot.slane %v158_v57, 4 }
 0x111   :  { %v153_v60 = vrot.slane %v152_v58, 2  ;;  %v160_v61 = vadd.f32 %v159_v59, %v158_v57 }
 0x113   :  { %v154_v62 = vadd.f32 %v153_v60, %v152_v58  ;;  %v161_v63 = vrot.slane %v160_v61, 2  ;;  %v281_v60 = vld [vmem:[%s993_s7] sm:$0x1] }
 0x115   :  { %v155_v1 = vrot.slane %v154_v62, 1  ;;  %v162_v2 = vadd.f32 %v161_v63, %v160_v61  ;;  %v282_v63 = vld [vmem:[%s994_s8] sm:$0x1] }
 0x117   :  { %v163_v3 = vrot.slane %v162_v2, 1  ;;  %v156_v4 = vadd.f32 %v155_v1, %v154_v62 }
 0x119   :  { %v164_v5 = vadd.f32 %v163_v3, %v162_v2  ;;  %v157_v6 = vmul.f32 0.125, %v156_v4 }
 0x11b   :  { %v165_v7 = vmul.f32 0.125, %v164_v5  ;;  %v166_v8 = vmul.f32 %v157_v6, %v157_v6 }
 0x11d   :  { %v167_v9 = vsub.f32 %v165_v7, %v166_v8 }
 0x11f   :  { %v168_v10 = vadd.f32 1e-05, %v167_v9 }
 0x121   :  { %658 = vrsqrt.f32 %v168_v10 }
 0x12b   :  { %v659_v15 = vpop.eup %658 }
 0x12c   :  { %v170_v16 = vmul.f32 %v659_v15, %v149_v13 }
 0x12e   :  { %v171_v18 = vmul.f32 %v170_v16, %v157_v6  ;;  %v177_v19 = vrot.slane %v170_v16, %v918_v14 }
 0x130   :  { %v172_v20 = vsub.f32 %v150_v17, %v171_v18  ;;  %v179_v21 = vmul.f32 %v177_v19, %v148_v55 }
 0x132   :  { %v184_v22 = vrot.slane %v172_v20, %v918_v14 }
 0x134   :  { %v186_v23 = vadd.f32 %v184_v22, %v179_v21 }
 0x136   :  { %572 = vmatmul.mubr.f32.vlgmr.msra.gmra.mrb[0].mxu1 %v186_v23 }
 0x209   :  { %v276_v37 = vpop.f32.mrb[0].mxu1 }
 0x20a   :  { %v277_v38 = vadd.f32 %v459_v36, %v276_v37  ;;  %v573_v39 = vpop.f32.mrb[1].mxu1 }
 0x20c   :  { %v280_v40 = vmax.f32 %v277_v38, 0.0 }
 0x20e   :  { %v284_v0 = vsel %vm283_vm1, %v280_v40, 0.0  ;;  %v292_v41 = vmul.f32 %v280_v40, %v280_v40 }
 0x20f   :  { %v285_v42 = vrot.slane %v284_v0, 4 }
 0x210   :  { %v293_v43 = vsel %vm283_vm1, %v292_v41, 0.0 }
 0x211   :  { %v286_v44 = vadd.f32 %v285_v42, %v284_v0  ;;  %v294_v45 = vrot.slane %v293_v43, 4 }
 0x213   :  { %v287_v46 = vrot.slane %v286_v44, 2  ;;  %v295_v47 = vadd.f32 %v294_v45, %v293_v43 }
 0x215   :  { %v288_v48 = vadd.f32 %v287_v46, %v286_v44  ;;  %v296_v49 = vrot.slane %v295_v47, 2 }
 0x217   :  { %v289_v50 = vrot.slane %v288_v48, 1  ;;  %v297_v51 = vadd.f32 %v296_v49, %v295_v47 }
 0x219   :  { %v290_v52 = vadd.f32 %v289_v50, %v288_v48  ;;  %v298_v53 = vrot.slane %v297_v51, 1 }
 0x21b   :  { %v291_v54 = vmul.f32 0.125, %v290_v52  ;;  %v299_v55 = vadd.f32 %v298_v53, %v297_v51 }
 0x21d   :  { %v300_v56 = vmul.f32 0.125, %v299_v55  ;;  %v301_v57 = vmul.f32 %v291_v54, %v291_v54 }
 0x21f   :  { %v302_v58 = vsub.f32 %v300_v56, %v301_v57 }
 0x221   :  { %v303_v59 = vadd.f32 1e-05, %v302_v58 }
 0x223   :  { %660 = vrsqrt.f32 %v303_v59 }
 0x22d   :  { %v661_v61 = vpop.eup %660 }
 0x22e   :  { %v305_v62 = vmul.f32 %v661_v61, %v281_v60 }
 0x230   :  { %v306_v1 = vmul.f32 %v305_v62, %v291_v54  ;;  %v312_v2 = vrot.slane %v305_v62, %v918_v14 }
 0x232   :  { %v307_v3 = vsub.f32 %v282_v63, %v306_v1  ;;  %v314_v4 = vmul.f32 %v312_v2, %v280_v40 }
 0x234   :  { %v319_v5 = vrot.slane %v307_v3, %v918_v14 }
 0x236   :  { %v321_v6 = vadd.f32 %v319_v5, %v314_v4 }
 0x238   :  { %591 = vmatmul.mubr.msk.f32.vlgmr.msra.gmra.mrb[2].mxu0 %vm283_vm1, %v321_v6 }
 0x30b   :  { %v399_v7 = vpop.f32.mrb[2].mxu0 }
 0x30c   :  { %v405_v8 = vrot.slane %v399_v7, 4  ;;  %v412_v9 = vmul.f32 %v399_v7, %v399_v7  ;;  %v592_v10 = vpop.f32.mrb[3].mxu0 }
 0x30e   :  { %v406_v11 = vadd.f32 %v405_v8, %v399_v7  ;;  %v413_v12 = vrot.slane %v412_v9, 4 }
 0x310   :  { %v407_v13 = vrot.slane %v406_v11, 2  ;;  %v414_v15 = vadd.f32 %v413_v12, %v412_v9 }
 0x312   :  { %v408_v16 = vadd.f32 %v407_v13, %v406_v11  ;;  %v415_v17 = vrot.slane %v414_v15, 2 }
 0x314   :  { %v409_v18 = vrot.slane %v408_v16, 1  ;;  %v416_v19 = vadd.f32 %v415_v17, %v414_v15 }
 0x316   :  { %v410_v20 = vadd.f32 %v409_v18, %v408_v16  ;;  %v417_v21 = vrot.slane %v416_v19, 1 }
 0x318   :  { %v411_v22 = vmul.f32 0.125, %v410_v20  ;;  %v418_v23 = vadd.f32 %v417_v21, %v416_v19 }
 0x31a   :  { %v419_v24 = vmul.f32 0.125, %v418_v23  ;;  %v420_v25 = vmul.f32 %v411_v22, %v411_v22 }
 0x31c   :  { %v421_v26 = vsub.f32 %v419_v24, %v420_v25 }
 0x31e   :  { %v422_v27 = vadd.f32 1e-05, %v421_v26 }
 0x320   :  { %662 = vrsqrt.f32 %v422_v27 }
 0x32a   :  { %v663_v29 = vpop.eup %662 }
 0x32b   :  { %v424_v30 = vmul.f32 %v663_v29, %v403_v28 }
 0x32d   :  { %v425_v32 = vmul.f32 %v424_v30, %v411_v22  ;;  %v431_v33 = vrot.slane %v424_v30, %v918_v14 }
 0x32f   :  { %v426_v34 = vsub.f32 %v404_v31, %v425_v32  ;;  %v433_v35 = vmul.f32 %v431_v33, %v399_v7 }
 0x331   :  { %v438_v36 = vrot.slane %v426_v34, %v918_v14 }
 0x333   :  { %v440_v37 = vadd.f32 %v438_v36, %v433_v35 }
 0x335   :  { %664 = vtanh.f32 %v440_v37 }
 0x33f   :  { %v665_v38 = vpop.eup %664 }
 0x340   :  { %442 = vst [vmem:[#allocation5] sm:$0xff] %v665_v38 }
 0x341   :  { %699 = shalt.err (!%p696_p12)
}
 0x342   :  { %s700_s24 = scalar_lea.hbm %s998_s12, 128 }
 0x343   :  { %p701_p13 = scmp.ne.s32.totalorder %s998_s12, %s700_s24  ;;  %p704_p0 = scmp.lt.u32.totalorder %s700_s24, %s998_s12 }
 0x345   :  { %p706_p1 = pnand %p704_p0, %p701_p13 }
 0x347   :  { %709 = shalt.err (!%p706_p1)
}
 0x348   :  { %452 = dma.vmem_to_hbm [thread:$0]  %s450_s22, 128, %s998_s12, [#allocation4]  }
 0x349   :  { %712 = dma.done.wait [#allocation4], 128  }
 0x34a   :  { %713 = vsyncadd [#allocation4], 4294967168 }
 0x34b   :  { %456 = vsyncpa [#allocation3], 1 }
 0x34c   :  { %457 = vsyncpa [#allocation4], 1 }

</bundles_post_ra>
